<compile_context>
chip_gen: v7x
topology: tpu7x:2x2x1
jax: 0.10.0
libtpu: 0.0.40
codegen_flags: <defaults>
</compile_context>

<pallas_src>
import jax
import jax.numpy as jnp
from jax.experimental import pallas as pl
from jax.experimental.pallas import tpu as pltpu

# ---- model sizes (small, consistent with the module's forward) ----
B, CIN, H, W = 2, 4, 16, 16       # input x: (B, CIN, H, W)  (NCHW, PyTorch style)
CMID = 8                          # conv stem output channels
PRE = 32                          # embedding.pre_output_categories
NCLS = 2                          # head: nn.Linear(PRE, 2)
KH = KW = 3                       # conv kernel

HW = H * W                        # 256 valid spatial positions per image
HP = H + 2                        # H padded top/bottom for the 3x3 conv
NFLAT = B * HP * W                # 576: both batches' H-padded images, row-major flattened
XSHIFT = (KH // 2) * W + (KW // 2)  # 17 = largest negative tap offset in flat coords
XLEN = 640                        # XSHIFT + NFLAT + 17 = 610 -> round up to 5 lane tiles
TAPW = CIN + 1                    # 4 channel rows + 1 constant "ones" row (bias fold)
CENTER_TAP = (KH // 2) * KW + (KW // 2)   # tap 4 (dy=1, dx=1): unmasked -> carries the bias

# packed-constants buffer layout (rows x cols, f32) -> ONE input DMA
ROW_CONV = 0                      # rows 0:8   -> 9 taps x (CIN weights + bias col) = 45 cols
ROW_FC1 = CMID                    # rows 8:40  -> fc1_w^T (32, 8) | fc1_b at col 8
ROW_OUT = ROW_FC1 + PRE           # rows 40:42 -> out_w^T (2, 32) | out_b at col 32
PACK_R = 48                       # padded to a multiple of 8 sublanes
PACK_C = 48                       # >= 45 needed columns


def _fs_kernel(xs_ref, w_ref, ot_ref):
    """Fused forward pass, fully in-kernel (conv taps built from lane-shifted slices).

    xs_ref : (CIN+1, XLEN) = (5, 640)  H-padded, batch-stacked, flattened input;
             row CIN is all-ones (folds the conv bias); cols [XSHIFT, XSHIFT+NFLAT)
             hold the data, the rest is zero guard.
    w_ref  : (PACK_R, PACK_C) packed constants (layout above)
    ot_ref : (NCLS, B) transposed log-softmax output (single full store)
    """
    xs = xs_ref[...]                                               # (5, 640), 5 vregs

    # lane coordinate helpers (VPU-only, computed once)
    lane = jax.lax.broadcasted_iota(jnp.int32, (1, NFLAT), 1)      # flat position p
    xcol = jnp.bitwise_and(lane, W - 1)                            # x = p % 16 (W is 2^4)
    left_edge = xcol == 0                                          # dx=-1 taps wrap here
    right_edge = xcol == (W - 1)                                   # dx=+1 taps wrap here

    # ---- conv 3x3 + bias as 9 shifted-slice matmuls (bias rides the ones row) ----
    a = None
    for t in range(KH * KW):
        dy, dx = divmod(t, KW)
        off = XSHIFT + (dy - 1) * W + (dx - 1)                     # static, >= 0
        sl = xs[:, off:off + NFLAT]                                # (CIN+1, 576)
        if dx == 0:                                                # kill left-edge wrap
            sl = jnp.where(left_edge, 0.0, sl)
        elif dx == KW - 1:                                         # kill right-edge wrap
            sl = jnp.where(right_edge, 0.0, sl)
        wt = w_ref[ROW_CONV:ROW_CONV + CMID, TAPW * t:TAPW * t + TAPW]   # (CMID, 5)
        contrib = jnp.dot(wt, sl, preferred_element_type=jnp.float32)    # (CMID, 576)
        a = contrib if a is None else a + contrib
    a = a * jax.nn.sigmoid(a)                                      # SiLU on 5 dense vregs

    # ---- global average pool: masked lane reductions on the dense slab (XLU idle) ----
    pooled_cols = []
    for b in range(B):
        lo = b * (HP * W) + W                                      # skip top pad row
        valid = (lane >= lo) & (lane < lo + HW)                    # this batch's 256 cols
        pooled_cols.append(
            jnp.sum(jnp.where(valid, a, 0.0), axis=1, keepdims=True))    # (CMID, 1)
    pooled = jnp.concatenate(pooled_cols, axis=1) * (1.0 / HW)     # (CMID, B)

    # ---- batched tail: ONE fc1 matmul, ONE head matmul, one log-softmax, one store ----
    # (fc1/head biases stay as single-vreg broadcast adds; folding would need an
    #  unaligned sublane concat for no measurable gain at (32,2)/(2,2).)
    w1 = w_ref[ROW_FC1:ROW_FC1 + PRE, 0:CMID]                      # (PRE, CMID)
    b1 = w_ref[ROW_FC1:ROW_FC1 + PRE, CMID:CMID + 1]               # (PRE, 1)
    h = jnp.dot(w1, pooled, preferred_element_type=jnp.float32) + b1    # (PRE, B)
    h = h * jax.nn.sigmoid(h)

    w2 = w_ref[ROW_OUT:ROW_OUT + NCLS, 0:PRE]                      # (NCLS, PRE)
    b2 = w_ref[ROW_OUT:ROW_OUT + NCLS, PRE:PRE + 1]                # (NCLS, 1)
    logit = jnp.dot(w2, h, preferred_element_type=jnp.float32) + b2      # (NCLS, B)

    m = jnp.max(logit, axis=0, keepdims=True)
    z = logit - m
    lse = jnp.log(jnp.sum(jnp.exp(z), axis=0, keepdims=True))
    ot_ref[...] = (z - lse).astype(ot_ref.dtype)                   # single full store


def _prep_input(x_nchw):
    """Layout-only glue (~13 KB): channel-major, H-padded, batch-stacked, flattened,
    left/right zero-guarded, plus a constant ones row for the conv-bias fold.
    Fuses into the pallas_call via allow_input_fusion."""
    x_cf = jnp.transpose(x_nchw, (1, 0, 2, 3)).astype(jnp.float32)        # (CIN, B, H, W)
    xph = jnp.pad(x_cf, ((0, 0), (0, 0), (1, 1), (0, 0)))                 # (CIN, B, HP, W)
    xflat = xph.reshape(CIN, NFLAT)                                       # (CIN, 576)
    xflat = jnp.pad(xflat, ((0, 0), (XSHIFT, XLEN - NFLAT - XSHIFT)))     # (CIN, 640)
    ones = jnp.ones((1, XLEN), jnp.float32)
    return jnp.concatenate([xflat, ones], axis=0)                         # (CIN+1, 640)


def pack_params(params):
    """Pack all (frozen + trainable) weights/biases into one (PACK_R, PACK_C) f32
    buffer -> a single constants DMA. Conv bias sits in the center tap's 5th column
    so it multiplies the slab's ones row inside the MXU. Done once."""
    wp = jnp.zeros((PACK_R, PACK_C), jnp.float32)
    cw = params["conv_w"]                                       # (KH, KW, CIN, CMID) HWIO
    cb = params["conv_b"].reshape(CMID)
    for t in range(KH * KW):
        dy, dx = divmod(t, KW)
        wp = wp.at[ROW_CONV:ROW_CONV + CMID, TAPW * t:TAPW * t + CIN].set(cw[dy, dx].T)
    wp = wp.at[ROW_CONV:ROW_CONV + CMID, TAPW * CENTER_TAP + CIN].set(cb)   # bias column
    wp = wp.at[ROW_FC1:ROW_FC1 + PRE, 0:CMID].set(params["fc1_w"].T)        # (PRE, CMID)
    wp = wp.at[ROW_FC1:ROW_FC1 + PRE, CMID].set(params["fc1_b"].reshape(PRE))
    wp = wp.at[ROW_OUT:ROW_OUT + NCLS, 0:PRE].set(params["out_w"].T)        # (NCLS, PRE)
    wp = wp.at[ROW_OUT:ROW_OUT + NCLS, PRE].set(params["out_b"].reshape(NCLS))
    return wp


@jax.jit
def fs_efficientnet_forward(x_nchw, w_pack):
    xs = _prep_input(x_nchw)                                     # (5, 640), ~13 KB

    vmem = pl.BlockSpec(memory_space=pltpu.MemorySpace.VMEM)
    cost = pl.CostEstimate(
        flops=2 * CMID * TAPW * NFLAT * (KH * KW) + 2 * PRE * CMID * B + 2 * NCLS * PRE * B,
        transcendentals=CMID * NFLAT + PRE * B + NCLS * B + B,
        bytes_accessed=(CIN + 1) * XLEN * 4 + PACK_R * PACK_C * 4 + NCLS * B * 4,
    )

    # Grid-less: whole problem is ~0.4 MFLOP / ~22 KB, per-step grid overhead would
    # dominate.  TODO(synk): add a spatial grid (+ "parallel" dims for v7x's 2 TCs,
    # tiles sized for 64 MiB VMEM) once the real EfficientNet stem replaces this stub.
    out_T = pl.pallas_call(
        _fs_kernel,
        out_shape=jax.ShapeDtypeStruct((NCLS, B), jnp.float32),
        in_specs=[vmem, vmem],
        out_specs=vmem,
        compiler_params=pltpu.CompilerParams(allow_input_fusion=[True, False]),
        cost_estimate=cost,
    )(xs, w_pack)

    return out_T.T                                               # (B, NCLS), 16-byte glue


def init_params():
    """Deterministic synthetic parameters (no checkpoint loading)."""
    k = jax.random.PRNGKey(42)
    k1, k2, k3, k4, k5, k6 = jax.random.split(k, 6)
    return {
        "conv_w": 0.1 * jax.random.normal(k1, (KH, KW, CIN, CMID), jnp.float32),  # HWIO
        "conv_b": 0.05 * jax.random.normal(k2, (1, CMID), jnp.float32),
        "fc1_w": 0.1 * jax.random.normal(k3, (CMID, PRE), jnp.float32),
        "fc1_b": 0.05 * jax.random.normal(k4, (1, PRE), jnp.float32),
        "out_w": 0.1 * jax.random.normal(k5, (PRE, NCLS), jnp.float32),
        "out_b": 0.05 * jax.random.normal(k6, (1, NCLS), jnp.float32),
    }


def reference_forward(x_nchw, params):
    """Plain-JAX reference (same math, independent NHWC im2col path)."""
    x = jnp.transpose(x_nchw, (0, 2, 3, 1)).astype(jnp.float32)      # NHWC
    xp = jnp.pad(x, ((0, 0), (1, 1), (1, 1), (0, 0)))
    taps = [xp[:, dy:dy + H, dx:dx + W, :] for dy in range(KH) for dx in range(KW)]
    patches = jnp.concatenate(taps, axis=-1).reshape(B * H * W, KH * KW * CIN)
    a = patches @ params["conv_w"].reshape(KH * KW * CIN, CMID) + params["conv_b"]
    a = a * jax.nn.sigmoid(a)
    pooled = jnp.mean(a.reshape(B, H * W, CMID), axis=1)
    h = pooled @ params["fc1_w"] + params["fc1_b"]
    h = h * jax.nn.sigmoid(h)
    logits = h @ params["out_w"] + params["out_b"]
    return jax.nn.log_softmax(logits, axis=1)


if __name__ == "__main__":
    key = jax.random.PRNGKey(0)
    x = jax.random.normal(key, (B, CIN, H, W), jnp.float32)          # NCHW like PyTorch
    params = init_params()
    w_pack = pack_params(params)                                     # one-time packing

    out = fs_efficientnet_forward(x, w_pack)
    out = jax.block_until_ready(out)

    ref = reference_forward(x, params)
    assert out.shape == (B, NCLS)
    assert jnp.allclose(out, ref, atol=1e-4, rtol=1e-4), (out, ref)
    print("KERNEL_OK")
</pallas_src>

<mosaic_0001>
module attributes {stable_mosaic.version = 11 : i64} {
  func.func @_fs_kernel(%arg0: memref<5x640xf32, #tpu.memory_space<vmem>>, %arg1: memref<48x48xf32, #tpu.memory_space<vmem>>, %arg2: memref<2x2xf32, #tpu.memory_space<vmem>>) attributes {dimension_semantics = [], scalar_prefetch = 0 : i64, scratch_operands = 0 : i64, tpu.core_type = #tpu.core_type<tc>} {
    %c0 = arith.constant 0 : index
    %c0_0 = arith.constant 0 : index
    %0 = vector.load %arg0[%c0, %c0_0] : memref<5x640xf32, #tpu.memory_space<vmem>>, vector<5x640xf32>
    %1 = tpu.iota {dimensions = array<i32: 1>} : vector<1x576xi32>
    %c15_i32 = arith.constant 15 : i32
    %2 = vector.broadcast %c15_i32 : i32 to vector<1x576xi32>
    %3 = arith.andi %1, %2 : vector<1x576xi32>
    %c0_i32 = arith.constant 0 : i32
    %4 = vector.broadcast %c0_i32 : i32 to vector<1x576xi32>
    %5 = arith.cmpi eq, %3, %4 : vector<1x576xi32>
    %c15_i32_1 = arith.constant 15 : i32
    %6 = vector.broadcast %c15_i32_1 : i32 to vector<1x576xi32>
    %7 = arith.cmpi eq, %3, %6 : vector<1x576xi32>
    %8 = vector.extract_strided_slice %0 {offsets = [0, 0], sizes = [5, 576], strides = [1, 1]} : vector<5x640xf32> to vector<5x576xf32>
    %cst = arith.constant 0.000000e+00 : f32
    %9 = vector.shape_cast %5 : vector<1x576xi1> to vector<1x576xi1>
    %10 = vector.broadcast %9 : vector<1x576xi1> to vector<5x576xi1>
    %11 = vector.broadcast %cst : f32 to vector<5x576xf32>
    %12 = arith.select %10, %11, %8 : vector<5x576xi1>, vector<5x576xf32>
    %c0_2 = arith.constant 0 : index
    %c0_3 = arith.constant 0 : index
    %13 = vector.load %arg1[%c0_2, %c0_3] : memref<48x48xf32, #tpu.memory_space<vmem>>, vector<8x5xf32>
    %cst_4 = arith.constant dense<0.000000e+00> : vector<8x576xf32>
    %14 = tpu.matmul %13, %12, %cst_4 {dimension_numbers = #tpu.dot_dimension_numbers<[1], [0], [0], [1], [0, 0, 1, 1], [], []>} : vector<8x5xf32>, vector<5x576xf32>, vector<8x576xf32> -> vector<8x576xf32>
    %15 = vector.extract_strided_slice %0 {offsets = [0, 1], sizes = [5, 576], strides = [1, 1]} : vector<5x640xf32> to vector<5x576xf32>
    %c0_5 = arith.constant 0 : index
    %c5 = arith.constant 5 : index
    %16 = vector.load %arg1[%c0_5, %c5] : memref<48x48xf32, #tpu.memory_space<vmem>>, vector<8x5xf32>
    %cst_6 = arith.constant dense<0.000000e+00> : vector<8x576xf32>
    %17 = tpu.matmul %16, %15, %cst_6 {dimension_numbers = #tpu.dot_dimension_numbers<[1], [0], [0], [1], [0, 0, 1, 1], [], []>} : vector<8x5xf32>, vector<5x576xf32>, vector<8x576xf32> -> vector<8x576xf32>
    %18 = arith.addf %14, %17 : vector<8x576xf32>
    %19 = vector.extract_strided_slice %0 {offsets = [0, 2], sizes = [5, 576], strides = [1, 1]} : vector<5x640xf32> to vector<5x576xf32>
    %cst_7 = arith.constant 0.000000e+00 : f32
    %20 = vector.shape_cast %7 : vector<1x576xi1> to vector<1x576xi1>
    %21 = vector.broadcast %20 : vector<1x576xi1> to vector<5x576xi1>
    %22 = vector.broadcast %cst_7 : f32 to vector<5x576xf32>
    %23 = arith.select %21, %22, %19 : vector<5x576xi1>, vector<5x576xf32>
    %c0_8 = arith.constant 0 : index
    %c10 = arith.constant 10 : index
    %24 = vector.load %arg1[%c0_8, %c10] : memref<48x48xf32, #tpu.memory_space<vmem>>, vector<8x5xf32>
    %cst_9 = arith.constant dense<0.000000e+00> : vector<8x576xf32>
    %25 = tpu.matmul %24, %23, %cst_9 {dimension_numbers = #tpu.dot_dimension_numbers<[1], [0], [0], [1], [0, 0, 1, 1], [], []>} : vector<8x5xf32>, vector<5x576xf32>, vector<8x576xf32> -> vector<8x576xf32>
    %26 = arith.addf %18, %25 : vector<8x576xf32>
    %27 = vector.extract_strided_slice %0 {offsets = [0, 16], sizes = [5, 576], strides = [1, 1]} : vector<5x640xf32> to vector<5x576xf32>
    %cst_10 = arith.constant 0.000000e+00 : f32
    %28 = vector.shape_cast %5 : vector<1x576xi1> to vector<1x576xi1>
    %29 = vector.broadcast %28 : vector<1x576xi1> to vector<5x576xi1>
    %30 = vector.broadcast %cst_10 : f32 to vector<5x576xf32>
    %31 = arith.select %29, %30, %27 : vector<5x576xi1>, vector<5x576xf32>
    %c0_11 = arith.constant 0 : index
    %c15 = arith.constant 15 : index
    %32 = vector.load %arg1[%c0_11, %c15] : memref<48x48xf32, #tpu.memory_space<vmem>>, vector<8x5xf32>
    %cst_12 = arith.constant dense<0.000000e+00> : vector<8x576xf32>
    %33 = tpu.matmul %32, %31, %cst_12 {dimension_numbers = #tpu.dot_dimension_numbers<[1], [0], [0], [1], [0, 0, 1, 1], [], []>} : vector<8x5xf32>, vector<5x576xf32>, vector<8x576xf32> -> vector<8x576xf32>
    %34 = arith.addf %26, %33 : vector<8x576xf32>
    %35 = vector.extract_strided_slice %0 {offsets = [0, 17], sizes = [5, 576], strides = [1, 1]} : vector<5x640xf32> to vector<5x576xf32>
    %c0_13 = arith.constant 0 : index
    %c20 = arith.constant 20 : index
    %36 = vector.load %arg1[%c0_13, %c20] : memref<48x48xf32, #tpu.memory_space<vmem>>, vector<8x5xf32>
    %cst_14 = arith.constant dense<0.000000e+00> : vector<8x576xf32>
    %37 = tpu.matmul %36, %35, %cst_14 {dimension_numbers = #tpu.dot_dimension_numbers<[1], [0], [0], [1], [0, 0, 1, 1], [], []>} : vector<8x5xf32>, vector<5x576xf32>, vector<8x576xf32> -> vector<8x576xf32>
    %38 = arith.addf %34, %37 : vector<8x576xf32>
    %39 = vector.extract_strided_slice %0 {offsets = [0, 18], sizes = [5, 576], strides = [1, 1]} : vector<5x640xf32> to vector<5x576xf32>
    %cst_15 = arith.constant 0.000000e+00 : f32
    %40 = vector.shape_cast %7 : vector<1x576xi1> to vector<1x576xi1>
    %41 = vector.broadcast %40 : vector<1x576xi1> to vector<5x576xi1>
    %42 = vector.broadcast %cst_15 : f32 to vector<5x576xf32>
    %43 = arith.select %41, %42, %39 : vector<5x576xi1>, vector<5x576xf32>
    %c0_16 = arith.constant 0 : index
    %c25 = arith.constant 25 : index
    %44 = vector.load %arg1[%c0_16, %c25] : memref<48x48xf32, #tpu.memory_space<vmem>>, vector<8x5xf32>
    %cst_17 = arith.constant dense<0.000000e+00> : vector<8x576xf32>
    %45 = tpu.matmul %44, %43, %cst_17 {dimension_numbers = #tpu.dot_dimension_numbers<[1], [0], [0], [1], [0, 0, 1, 1], [], []>} : vector<8x5xf32>, vector<5x576xf32>, vector<8x576xf32> -> vector<8x576xf32>
    %46 = arith.addf %38, %45 : vector<8x576xf32>
    %47 = vector.extract_strided_slice %0 {offsets = [0, 32], sizes = [5, 576], strides = [1, 1]} : vector<5x640xf32> to vector<5x576xf32>
    %cst_18 = arith.constant 0.000000e+00 : f32
    %48 = vector.shape_cast %5 : vector<1x576xi1> to vector<1x576xi1>
    %49 = vector.broadcast %48 : vector<1x576xi1> to vector<5x576xi1>
    %50 = vector.broadcast %cst_18 : f32 to vector<5x576xf32>
    %51 = arith.select %49, %50, %47 : vector<5x576xi1>, vector<5x576xf32>
    %c0_19 = arith.constant 0 : index
    %c30 = arith.constant 30 : index
    %52 = vector.load %arg1[%c0_19, %c30] : memref<48x48xf32, #tpu.memory_space<vmem>>, vector<8x5xf32>
    %cst_20 = arith.constant dense<0.000000e+00> : vector<8x576xf32>
    %53 = tpu.matmul %52, %51, %cst_20 {dimension_numbers = #tpu.dot_dimension_numbers<[1], [0], [0], [1], [0, 0, 1, 1], [], []>} : vector<8x5xf32>, vector<5x576xf32>, vector<8x576xf32> -> vector<8x576xf32>
    %54 = arith.addf %46, %53 : vector<8x576xf32>
    %55 = vector.extract_strided_slice %0 {offsets = [0, 33], sizes = [5, 576], strides = [1, 1]} : vector<5x640xf32> to vector<5x576xf32>
    %c0_21 = arith.constant 0 : index
    %c35 = arith.constant 35 : index
    %56 = vector.load %arg1[%c0_21, %c35] : memref<48x48xf32, #tpu.memory_space<vmem>>, vector<8x5xf32>
    %cst_22 = arith.constant dense<0.000000e+00> : vector<8x576xf32>
    %57 = tpu.matmul %56, %55, %cst_22 {dimension_numbers = #tpu.dot_dimension_numbers<[1], [0], [0], [1], [0, 0, 1, 1], [], []>} : vector<8x5xf32>, vector<5x576xf32>, vector<8x576xf32> -> vector<8x576xf32>
    %58 = arith.addf %54, %57 : vector<8x576xf32>
    %59 = vector.extract_strided_slice %0 {offsets = [0, 34], sizes = [5, 576], strides = [1, 1]} : vector<5x640xf32> to vector<5x576xf32>
    %cst_23 = arith.constant 0.000000e+00 : f32
    %60 = vector.shape_cast %7 : vector<1x576xi1> to vector<1x576xi1>
    %61 = vector.broadcast %60 : vector<1x576xi1> to vector<5x576xi1>
    %62 = vector.broadcast %cst_23 : f32 to vector<5x576xf32>
    %63 = arith.select %61, %62, %59 : vector<5x576xi1>, vector<5x576xf32>
    %c0_24 = arith.constant 0 : index
    %c40 = arith.constant 40 : index
    %64 = vector.load %arg1[%c0_24, %c40] : memref<48x48xf32, #tpu.memory_space<vmem>>, vector<8x5xf32>
    %cst_25 = arith.constant dense<0.000000e+00> : vector<8x576xf32>
    %65 = tpu.matmul %64, %63, %cst_25 {dimension_numbers = #tpu.dot_dimension_numbers<[1], [0], [0], [1], [0, 0, 1, 1], [], []>} : vector<8x5xf32>, vector<5x576xf32>, vector<8x576xf32> -> vector<8x576xf32>
    %66 = arith.addf %58, %65 : vector<8x576xf32>
    %67 = arith.negf %66 : vector<8x576xf32>
    %68 = math.exp %67 : vector<8x576xf32>
    %cst_26 = arith.constant 1.000000e+00 : f32
    %69 = vector.broadcast %cst_26 : f32 to vector<8x576xf32>
    %70 = arith.addf %69, %68 : vector<8x576xf32>
    %71 = arith.divf %69, %70 : vector<8x576xf32>
    %72 = arith.mulf %66, %71 : vector<8x576xf32>
    %c16_i32 = arith.constant 16 : i32
    %73 = vector.broadcast %c16_i32 : i32 to vector<1x576xi32>
    %74 = arith.cmpi sge, %1, %73 : vector<1x576xi32>
    %c272_i32 = arith.constant 272 : i32
    %75 = vector.broadcast %c272_i32 : i32 to vector<1x576xi32>
    %76 = arith.cmpi slt, %1, %75 : vector<1x576xi32>
    %77 = arith.andi %74, %76 : vector<1x576xi1>
    %cst_27 = arith.constant 0.000000e+00 : f32
    %78 = vector.shape_cast %77 : vector<1x576xi1> to vector<1x576xi1>
    %79 = vector.broadcast %78 : vector<1x576xi1> to vector<8x576xi1>
    %80 = vector.broadcast %cst_27 : f32 to vector<8x576xf32>
    %81 = arith.select %79, %72, %80 : vector<8x576xi1>, vector<8x576xf32>
    %cst_28 = arith.constant dense<0.000000e+00> : vector<8xf32>
    %82 = vector.multi_reduction <add>, %81, %cst_28 [1] : vector<8x576xf32> to vector<8xf32>
    %83 = vector.shape_cast %82 : vector<8xf32> to vector<8x1xf32>
    %c304_i32 = arith.constant 304 : i32
    %84 = vector.broadcast %c304_i32 : i32 to vector<1x576xi32>
    %85 = arith.cmpi sge, %1, %84 : vector<1x576xi32>
    %c560_i32 = arith.constant 560 : i32
    %86 = vector.broadcast %c560_i32 : i32 to vector<1x576xi32>
    %87 = arith.cmpi slt, %1, %86 : vector<1x576xi32>
    %88 = arith.andi %85, %87 : vector<1x576xi1>
    %cst_29 = arith.constant 0.000000e+00 : f32
    %89 = vector.shape_cast %88 : vector<1x576xi1> to vector<1x576xi1>
    %90 = vector.broadcast %89 : vector<1x576xi1> to vector<8x576xi1>
    %91 = vector.broadcast %cst_29 : f32 to vector<8x576xf32>
    %92 = arith.select %90, %72, %91 : vector<8x576xi1>, vector<8x576xf32>
    %cst_30 = arith.constant dense<0.000000e+00> : vector<8xf32>
    %93 = vector.multi_reduction <add>, %92, %cst_30 [1] : vector<8x576xf32> to vector<8xf32>
    %94 = vector.shape_cast %93 : vector<8xf32> to vector<8x1xf32>
    %95 = tpu.concatenate %83, %94 in 1 : vector<8x1xf32>, vector<8x1xf32> -> vector<8x2xf32>
    %cst_31 = arith.constant 3.906250e-03 : f32
    %96 = vector.broadcast %cst_31 : f32 to vector<8x2xf32>
    %97 = arith.mulf %95, %96 : vector<8x2xf32>
    %c8 = arith.constant 8 : index
    %c0_32 = arith.constant 0 : index
    %98 = vector.load %arg1[%c8, %c0_32] : memref<48x48xf32, #tpu.memory_space<vmem>>, vector<32x8xf32>
    %c8_33 = arith.constant 8 : index
    %c8_34 = arith.constant 8 : index
    %99 = vector.load %arg1[%c8_33, %c8_34] : memref<48x48xf32, #tpu.memory_space<vmem>>, vector<32x1xf32>
    %cst_35 = arith.constant dense<0.000000e+00> : vector<32x2xf32>
    %100 = tpu.matmul %98, %97, %cst_35 {dimension_numbers = #tpu.dot_dimension_numbers<[1], [0], [0], [1], [0, 0, 1, 1], [], []>} : vector<32x8xf32>, vector<8x2xf32>, vector<32x2xf32> -> vector<32x2xf32>
    %101 = vector.broadcast %99 : vector<32x1xf32> to vector<32x2xf32>
    %102 = arith.addf %100, %101 : vector<32x2xf32>
    %103 = arith.negf %102 : vector<32x2xf32>
    %104 = math.exp %103 : vector<32x2xf32>
    %cst_36 = arith.constant 1.000000e+00 : f32
    %105 = vector.broadcast %cst_36 : f32 to vector<32x2xf32>
    %106 = arith.addf %105, %104 : vector<32x2xf32>
    %107 = arith.divf %105, %106 : vector<32x2xf32>
    %108 = arith.mulf %102, %107 : vector<32x2xf32>
    %c40_37 = arith.constant 40 : index
    %c0_38 = arith.constant 0 : index
    %109 = vector.load %arg1[%c40_37, %c0_38] : memref<48x48xf32, #tpu.memory_space<vmem>>, vector<2x32xf32>
    %c40_39 = arith.constant 40 : index
    %c32 = arith.constant 32 : index
    %110 = vector.load %arg1[%c40_39, %c32] : memref<48x48xf32, #tpu.memory_space<vmem>>, vector<2x1xf32>
    %cst_40 = arith.constant dense<0.000000e+00> : vector<2x2xf32>
    %111 = tpu.matmul %109, %108, %cst_40 {dimension_numbers = #tpu.dot_dimension_numbers<[1], [0], [0], [1], [0, 0, 1, 1], [], []>} : vector<2x32xf32>, vector<32x2xf32>, vector<2x2xf32> -> vector<2x2xf32>
    %112 = vector.broadcast %110 : vector<2x1xf32> to vector<2x2xf32>
    %113 = arith.addf %111, %112 : vector<2x2xf32>
    %cst_41 = arith.constant dense<0xFF800000> : vector<2xf32>
    %114 = vector.multi_reduction <maximumf>, %113, %cst_41 [0] : vector<2x2xf32> to vector<2xf32>
    %115 = vector.shape_cast %114 : vector<2xf32> to vector<1x2xf32>
    %116 = vector.broadcast %115 : vector<1x2xf32> to vector<2x2xf32>
    %117 = arith.subf %113, %116 : vector<2x2xf32>
    %118 = math.exp %117 : vector<2x2xf32>
    %cst_42 = arith.constant dense<0.000000e+00> : vector<2xf32>
    %119 = vector.multi_reduction <add>, %118, %cst_42 [0] : vector<2x2xf32> to vector<2xf32>
    %120 = vector.shape_cast %119 : vector<2xf32> to vector<1x2xf32>
    %121 = math.log %120 : vector<1x2xf32>
    %122 = vector.broadcast %121 : vector<1x2xf32> to vector<2x2xf32>
    %123 = arith.subf %117, %122 : vector<2x2xf32>
    %c0_43 = arith.constant 0 : index
    %c0_44 = arith.constant 0 : index
    %124 = vector.load %arg2[%c0_43, %c0_44] : memref<2x2xf32, #tpu.memory_space<vmem>>, vector<2x2xf32>
    tpu.vector_store %arg2[%c0_43, %c0_44], %123 {strides = array<i32>} : memref<2x2xf32, #tpu.memory_space<vmem>>, vector<2x2xf32>,
    return
  }
}

</mosaic_0001>

<bundles_post_ra>
// kernel: fs_efficientnet_forward.2
= control target key start
LH: loop header
LB: loop body
LE: loop exit
PB: predicated region body
PF: predicated region fallthrough
CT: control target
= control target key end

     0   :  { %s3695_s0 = inlined_call_operand.vmem [shape: f32[48,48], index: 0, kind: input, shape index: {}]   ;;  %s3696_s1 = inlined_call_operand.vmem [shape: f32[4,576], index: 1, kind: input, shape index: {}]   ;;  %s3697_s2 = inlined_call_operand.<no memory space> [shape: f32[], index: 2, kind: input, shape index: {}]   ;;  %s3698_s3 = inlined_call_operand.<no memory space> [shape: f32[], index: 3, kind: input, shape index: {}]   ;;  %s3699_s4 = inlined_call_operand.<no memory space> [shape: s32[], index: 4, kind: input, shape index: {}]   ;;  %s3700_s5 = inlined_call_operand.vmem [shape: f32[2,2], index: 5, kind: output, shape index: {}]  }
   0x1   :  { %v10_v0 = vstv %s3697_s2  ;;  %v11_v1 = vstv %s3698_s3  ;;  %v12_v2 = vstv %s3699_s4 }
   0x2   :  { %v22_v3 = vlaneseq  ;;  %v2885_v4 = vld [vmem:[%s3696_s1] sm:$0xf]  ;;  %v2886_v5 = vld [vmem:[%s3696_s1 + $0x4] sm:$0xf]  ;;  %v2887_v8 = vld [vmem:[%s3696_s1 + $0x8] sm:$0xf] }
   0x3   :  { %v2888_v9 = vld [vmem:[%s3696_s1 + $0xc] sm:$0xf]  ;;  %v2889_v10 = vld [vmem:[%s3696_s1 + $0x10] sm:$0xf]  ;;  %s3187_s6 = smov 17   ;;  %v3280_v23 = vld [vmem:[%s3695_s0] sm:$0xff] }
   0x4   :  { %v23_v6 = vshrl.u32 %v22_v3, 7  ;;  %v3254_v7 = vand.u32 127, %v22_v3  ;;  %s3188_s8 = smov 123   ;;  %s3189_s9 = smov 118   ;;  %v3190_v24 = vmov 0.0   ;;  %vm3193_vm4 = vmmov 0  }
   0x5   :  { %3009 = vmatprep.subr.mxu0 %v3190_v24  ;;  %332 = vmatprep.mubr.f32.mxu1 %v3190_v24  ;;  %s3191_s10 = smov 113   ;;  %s3192_s11 = smov 127   ;;  %vm257_vm6 = vcmask 1044480   ;;  %vm254_vm7 = vcmask 39936   ;;  %vm249_vm8 = vcmask 1039360   ;;  %vm729_vm9 = vcmask 1031168  }
   0x6   :  { %vm25_vm0 = vcmp.lt.s32.totalorder %v23_v6, 4  ;;  %vm34_vm1 = vcmp.lt.s32.totalorder %v3254_v7, 111  ;;  %v164_v11 = vadd.s32 640, %v3254_v7  ;;  %vm3287_vm3 = vcmp.lt.s32.totalorder %v23_v6, %v12_v2  ;;  %3011 = vmatprep.mubr.msk.f32.mxu0 %vm3193_vm4, %v3190_v24  ;;  %s3194_s12 = smov 126   ;;  %s3195_s13 = smov 112  }
   0x7   :  { %v26_v12 = vsel %vm25_vm0, %v2885_v4, %v10_v0  ;;  %v59_v13 = vsel %vm25_vm0, %v2886_v5, %v10_v0  ;;  %v93_v14 = vsel %vm25_vm0, %v2887_v8, %v10_v0  ;;  %v127_v15 = vsel %vm25_vm0, %v2888_v9, %v10_v0  ;;  %s3196_s14 = smov 111   ;;  %s3197_s15 = smov 108  }
   0x8   :  { %v68_v16 = vsel %vm34_vm1, %v59_v13, %v26_v12  ;;  %v35_v17 = vsel %vm34_vm1, %v26_v12, %v10_v0  ;;  %v161_v18 = vsel %vm25_vm0, %v2889_v10, %v10_v0  ;;  %vm165_vm2 = vcmp.lt.s32.totalorder %v164_v11, 704  ;;  %s3198_s16 = smov 110   ;;  %s3199_s17 = smov 103  }
   0x9   :  { %69 = vrot.lane.b32.xlu0 %v68_v16, %s3187_s6  ;;  %36 = vrot.lane.b32.xlu1 %v35_v17, %s3187_s6  ;;  %v102_v19 = vsel %vm34_vm1, %v93_v14, %v59_v13  ;;  %v136_v20 = vsel %vm34_vm1, %v127_v15, %v93_v14  ;;  %v166_v21 = vsel %vm165_vm2, %v161_v18, %v10_v0  ;;  %v3300_v34 = vadd.s32 512, %v3254_v7  ;;  %s3200_s18 = smov 96   ;;  %s3201_s19 = smov 98  }
   0xa   :  { %v170_v22 = vsel %vm34_vm1, %v166_v21, %v127_v15  ;;  %s3202_s20 = smov 95   ;;  %s3203_s21 = smov 93   ;;  %v196_v53 = vadd.s32 128, %v3254_v7  ;;  %v200_v61 = vand.u32 15, %v3254_v7  ;;  %v198_v63 = vadd.s32 384, %v3254_v7 }
   0xb   :  { %v204_v39 = vand.u32 15, %v3300_v34  ;;  %s3204_s22 = smov 94   ;;  %s3205_s23 = smov 88   ;;  %v3397_v5 = vadd.s32 256, %v3254_v7  ;;  %vm990_vm0 = vcmask 916480  }
   0xc   :  { %v201_v56 = vand.u32 15, %v196_v53  ;;  %vm3390_vm11 = vcmp.eq.s32.totalorder %v200_v61, 15  ;;  %v203_v10 = vand.u32 15, %v198_v63  ;;  %vm3420_vm13 = vcmp.eq.s32.totalorder %v200_v61, 0 }
   0xd   :  { %103 = vrot.lane.b32.xlu0 %v102_v19, %s3187_s6  ;;  %137 = vrot.lane.b32.xlu1 %v136_v20, %s3187_s6  ;;  %vm3320_vm5 = vcmp.eq.s32.totalorder %v204_v39, 0  ;;  %v202_v13 = vand.u32 15, %v3397_v5  ;;  %vm3466_vm1 = vcmp.eq.s32.totalorder %v204_v39, 15 }
   0xe   :  { %vm3377_vm10 = vcmp.eq.s32.totalorder %v201_v56, 15  ;;  %vm3403_vm12 = vcmp.eq.s32.totalorder %v201_v56, 0  ;;  %vm3427_vm14 = vcmp.eq.s32.totalorder %v203_v10, 0  ;;  %vm3470_vm2 = vcmp.eq.s32.totalorder %v203_v10, 15 }
   0xf   :  { %vm3445_vm15 = vcmp.eq.s32.totalorder %v202_v13, 0 }
  0x11   :  { %171 = vrot.lane.b32.xlu0 %v170_v22, %s3187_s6 }
  0x15   :  { %232 = vrot.lane.b32.xlu0 %v3280_v23, %s3188_s8 }
  0x19   :  { %744 = vrot.lane.b32.xlu0 %v3280_v23, %s3189_s9 }
  0x1d   :  { %1005 = vrot.lane.b32.xlu0 %v3280_v23, %s3191_s10 }
  0x7b   :  { %v70_v26 = vpop.permute.xlu0 %69  ;;  %v37_v27 = vpop.permute.xlu1 %36 }
  0x7c   :  { %v82_v28 = vsel %vm3287_vm3, %v70_v26, %v11_v1  ;;  %v49_v29 = vsel %vm3287_vm3, %v37_v27, %v11_v1 }
  0x7d   :  { %86 = vst [vmem:[#allocation7 + $0x8] sm:$0xff] %v82_v28  ;;  %52 = vst [vmem:[#allocation7] sm:$0xff] %v49_v29 }
  0x7f   :  { %v104_v30 = vpop.permute.xlu0 %103  ;;  %v138_v31 = vpop.permute.xlu1 %137 }
  0x80   :  { %v116_v32 = vsel %vm3287_vm3, %v104_v30, %v11_v1  ;;  %v150_v33 = vsel %vm3287_vm3, %v138_v31, %v11_v1 }
  0x81   :  { %120 = vst [vmem:[#allocation7 + $0x10] sm:$0xff] %v116_v32  ;;  %154 = vst [vmem:[#allocation7 + $0x18] sm:$0xff] %v150_v33 }
  0x83   :  { %v172_v35 = vpop.permute.xlu0 %171 }
  0x84   :  { %v3302_v36 = vld [vmem:[#allocation7 + $0x8] sm:$0x1f]  ;;  %v184_v37 = vsel %vm3287_vm3, %v172_v35, %v11_v1  ;;  %v3307_v38 = vld [vmem:[#allocation7] sm:$0x1f]  ;;  %vm3474_vm3 = vcmp.eq.s32.totalorder %v202_v13, 15 }
  0x85   :  { %241 = vrot.lane.b32.xlu1 %v3302_v36, %s3192_s11  ;;  %188 = vst [vmem:[#allocation7 + $0x20] sm:$0xff] %v184_v37  ;;  %v226_v14 = vsel %vm3403_vm12, 0.0, %v3302_v36  ;;  %v225_v18 = vsel %vm3420_vm13, 0.0, %v3307_v38 }
  0x87   :  { %v233_v45 = vpop.permute.xlu0 %232 }
  0x88   :  { %v3312_v40 = vld [vmem:[#allocation7 + $0x10] sm:$0x1f]  ;;  %v3316_v41 = vld [vmem:[#allocation7 + $0x18] sm:$0x1f] }
  0x89   :  { %243 = vrot.lane.b32.xlu0 %v3312_v40, %s3192_s11  ;;  %239 = vrot.lane.b32.xlu1 %v3307_v38, %s3192_s11  ;;  %v228_v20 = vsel %vm3427_vm14, 0.0, %v3316_v41  ;;  %v227_v25 = vsel %vm3445_vm15, 0.0, %v3312_v40 }
  0x8b   :  { %v3364_v46 = vpop.permute.xlu0 %744 }
  0x8c   :  { %v193_v43 = vld [vmem:[#allocation7 + $0x20] sm:$0x1f] }
  0x8d   :  { %723 = vrot.lane.b32.xlu0 %v3312_v40, %s3194_s12  ;;  %245 = vrot.lane.b32.xlu1 %v3316_v41, %s3192_s11  ;;  %v229_v44 = vsel %vm3320_vm5, 0.0, %v193_v43 }
  0x8e   :  { %3010 = vmatpush3.msk.msra.mxu0 %vm257_vm6, %v229_v44 }
  0x8f   :  { %3012 = vmatmul.mubr.msk.f32.vlgmr.msra.gmra.mrb[0].mxu0 %vm254_vm7, %v3280_v23  ;;  %v3366_v47 = vpop.permute.xlu0 %1005 }
  0x90   :  { %827 = vmatprep.mubr.f32.mxu0 %v3190_v24 }
  0x91   :  { %984 = vrot.lane.b32.xlu0 %v3312_v40, %s3195_s13  ;;  %721 = vrot.lane.b32.xlu1 %v3302_v36, %s3194_s12 }
  0x95   :  { %247 = vrot.lane.b32.xlu0 %v193_v43, %s3192_s11  ;;  %719 = vrot.lane.b32.xlu1 %v3307_v38, %s3194_s12 }
  0x99   :  { %1247 = vrot.lane.b32.xlu0 %v3312_v40, %s3196_s14  ;;  %725 = vrot.lane.b32.xlu1 %v3316_v41, %s3194_s12 }
  0x9d   :  { %1241 = vrot.lane.b32.xlu0 %v3280_v23, %s3197_s15  ;;  %982 = vrot.lane.b32.xlu1 %v3302_v36, %s3195_s13 }
  0xa1   :  { %1491 = vrot.lane.b32.xlu0 %v3312_v40, %s3198_s16  ;;  %980 = vrot.lane.b32.xlu1 %v3307_v38, %s3195_s13 }
  0xa5   :  { %1512 = vrot.lane.b32.xlu0 %v3280_v23, %s3199_s17  ;;  %986 = vrot.lane.b32.xlu1 %v3316_v41, %s3195_s13 }
  0xa9   :  { %727 = vrot.lane.b32.xlu0 %v193_v43, %s3194_s12  ;;  %1245 = vrot.lane.b32.xlu1 %v3302_v36, %s3196_s14 }
  0xad   :  { %1752 = vrot.lane.b32.xlu0 %v3312_v40, %s3200_s18  ;;  %1243 = vrot.lane.b32.xlu1 %v3307_v38, %s3196_s14 }
  0xb1   :  { %988 = vrot.lane.b32.xlu0 %v193_v43, %s3195_s13  ;;  %1249 = vrot.lane.b32.xlu1 %v3316_v41, %s3196_s14 }
  0xb5   :  { %1773 = vrot.lane.b32.xlu0 %v3280_v23, %s3201_s19  ;;  %1489 = vrot.lane.b32.xlu1 %v3302_v36, %s3198_s16 }
  0xb9   :  { %1251 = vrot.lane.b32.xlu0 %v193_v43, %s3196_s14  ;;  %1487 = vrot.lane.b32.xlu1 %v3307_v38, %s3198_s16 }
  0xbd   :  { %2015 = vrot.lane.b32.xlu0 %v3312_v40, %s3202_s20  ;;  %1493 = vrot.lane.b32.xlu1 %v3316_v41, %s3198_s16 }
  0xc1   :  { %1495 = vrot.lane.b32.xlu0 %v193_v43, %s3198_s16  ;;  %1750 = vrot.lane.b32.xlu1 %v3302_v36, %s3200_s18 }
  0xc5   :  { %2009 = vrot.lane.b32.xlu0 %v3280_v23, %s3203_s21  ;;  %1748 = vrot.lane.b32.xlu1 %v3307_v38, %s3200_s18 }
  0xc9   :  { %1756 = vrot.lane.b32.xlu0 %v193_v43, %s3200_s18  ;;  %1754 = vrot.lane.b32.xlu1 %v3316_v41, %s3200_s18 }
  0xcd   :  { %2259 = vrot.lane.b32.xlu0 %v3312_v40, %s3204_s22  ;;  %2013 = vrot.lane.b32.xlu1 %v3302_v36, %s3202_s20 }
  0xd1   :  { %2019 = vrot.lane.b32.xlu0 %v193_v43, %s3202_s20  ;;  %2011 = vrot.lane.b32.xlu1 %v3307_v38, %s3202_s20 }
  0xd5   :  { %2280 = vrot.lane.b32.xlu0 %v3280_v23, %s3205_s23  ;;  %2017 = vrot.lane.b32.xlu1 %v3316_v41, %s3202_s20 }
  0xd9   :  { %2263 = vrot.lane.b32.xlu0 %v193_v43, %s3204_s22  ;;  %2257 = vrot.lane.b32.xlu1 %v3302_v36, %s3204_s22 }
  0xdd   :  { %2255 = vrot.lane.b32.xlu1 %v3307_v38, %s3204_s22 }
  0xe1   :  { %2261 = vrot.lane.b32.xlu1 %v3316_v41, %s3204_s22 }
  0xf7   :  { %v242_v48 = vpop.permute.xlu1 %241 }
  0xfb   :  { %v244_v49 = vpop.permute.xlu0 %243  ;;  %v240_v50 = vpop.permute.xlu1 %239 }
  0xfc   :  { %v251_v51 = vsel %vm249_vm8, %v242_v48, %v244_v49  ;;  %v250_v52 = vsel %vm249_vm8, %v240_v50, %v242_v48 }
  0xfd   :  { %2890 = vmatprep.subr.msk.mxu1 %vm257_vm6, %v251_v51 }
  0xfe   :  { %2891 = vmatpush1.msk.msra.mxu1 %vm257_vm6, %v250_v52 }
  0xff   :  { %v3373_v54 = vpop.permute.xlu0 %723  ;;  %2892 = vmatmul.mubr.msk.f32.vlgmr.msra.gmra.mrb[0].mxu1 %vm254_vm7, %v233_v45  ;;  %v246_v55 = vpop.permute.xlu1 %245 }
 0x100   :  { %403 = vmatprep.mubr.f32.mxu1 %v3190_v24  ;;  %v252_v6 = vsel %vm249_vm8, %v244_v49, %v246_v55 }
 0x103   :  { %v3381_v58 = vpop.permute.xlu0 %984  ;;  %v722_v59 = vpop.permute.xlu1 %721 }
 0x104   :  { %v731_v60 = vsel %vm729_vm9, %v722_v59, %v3373_v54 }
 0x105   :  { %v740_v62 = vsel %vm3377_vm10, 0.0, %v731_v60 }
 0x106   :  { %2906 = vmatprep.subr.msk.mxu0 %vm257_vm6, %v740_v62 }
 0x107   :  { %v248_v1 = vpop.permute.xlu0 %247  ;;  %v720_v2 = vpop.permute.xlu1 %719 }
 0x108   :  { %v253_v3 = vsel %vm249_vm8, %v246_v55, %v248_v1  ;;  %v730_v4 = vsel %vm729_vm9, %v720_v2, %v722_v59  ;;  %vm1253_vm8 = vcmask 908288  }
 0x109   :  { %v739_v8 = vsel %vm3390_vm11, 0.0, %v730_v4  ;;  %2893 = vmatprep.subr.msk.mxu1 %vm257_vm6, %v253_v3 }
 0x10a   :  { %2894 = vmatpush1.msk.msra.mxu1 %vm257_vm6, %v252_v6  ;;  %2907 = vmatpush1.msk.msra.mxu0 %vm257_vm6, %v739_v8 }
 0x10b   :  { %v3409_v11 = vpop.permute.xlu0 %1247  ;;  %2895 = vmatmul.mubr.msk.f32.vlgmr.msra.gmra.mrb[2].mxu1 %vm254_vm7, %v233_v45  ;;  %3004 = vmatprep.subr.mxu1 %v3190_v24  ;;  %v726_v12 = vpop.permute.xlu1 %725 }
 0x10c   :  { %2908 = vmatmul.mubr.msk.f32.vlgmr.msra.gmra.mrb[2].mxu0 %vm254_vm7, %v3364_v46  ;;  %3005 = vmatpush3.msk.msra.mxu1 %vm257_vm6, %v248_v1 }
 0x10d   :  { %2898 = vmatprep.subr.msk.mxu1 %vm257_vm6, %v226_v14  ;;  %3006 = vmatprep.mubr.msk.f32.mxu1 %vm3193_vm4, %v3190_v24 }
 0x10e   :  { %3014 = vmatprep.subr.mxu0 %v3190_v24  ;;  %3016 = vmatprep.mubr.msk.f32.mxu0 %vm3193_vm4, %v3190_v24 }
 0x10f   :  { %v3434_v17 = vpop.permute.xlu0 %1241  ;;  %3007 = vmatmul.mubr.msk.f32.vlgmr.msra.gmra.mrb[4].mxu1 %vm254_vm7, %v233_v45  ;;  %v983_v19 = vpop.permute.xlu1 %982 }
 0x110   :  { %2899 = vmatpush1.msk.msra.mxu1 %vm257_vm6, %v225_v18  ;;  %561 = vmatprep.mubr.f32.mxu1 %v3190_v24  ;;  %v992_v32 = vsel %vm990_vm0, %v983_v19, %v3381_v58 }
 0x111   :  { %2901 = vmatprep.subr.msk.mxu1 %vm257_vm6, %v228_v20  ;;  %v1001_v41 = vsel %vm3403_vm12, 0.0, %v992_v32 }
 0x113   :  { %v3450_v22 = vpop.permute.xlu0 %1491  ;;  %2900 = vmatmul.mubr.msk.f32.vlgmr.msra.gmra.mrb[0].mxu1 %vm254_vm7, %v3280_v23  ;;  %v981_v26 = vpop.permute.xlu1 %980 }
 0x114   :  { %2902 = vmatpush1.msk.msra.mxu1 %vm257_vm6, %v227_v25  ;;  %632 = vmatprep.mubr.f32.mxu1 %v3190_v24  ;;  %v991_v36 = vsel %vm990_vm0, %v981_v26, %v983_v19 }
 0x115   :  { %v1000_v43 = vsel %vm3420_vm13, 0.0, %v991_v36 }
 0x117   :  { %v3459_v27 = vpop.permute.xlu0 %1512  ;;  %v987_v28 = vpop.permute.xlu1 %986  ;;  %2903 = vmatmul.mubr.msk.f32.vlgmr.msra.gmra.mrb[2].mxu1 %vm254_vm7, %v3280_v23  ;;  %v732_v23 = vsel %vm729_vm9, %v3373_v54, %v726_v12 }
 0x118   :  { %898 = vmatprep.mubr.f32.mxu1 %v3190_v24  ;;  %v741_v40 = vsel %vm3474_vm3, 0.0, %v732_v23  ;;  %v993_v48 = vsel %vm990_vm0, %v3381_v58, %v987_v28 }
 0x119   :  { %v1002_v53 = vsel %vm3445_vm15, 0.0, %v993_v48 }
 0x11b   :  { %v728_v33 = vpop.permute.xlu0 %727  ;;  %v1246_v35 = vpop.permute.xlu1 %1245 }
 0x11c   :  { %v733_v37 = vsel %vm729_vm9, %v726_v12, %v728_v33  ;;  %v743_v38 = vsel %vm3466_vm1, 0.0, %v728_v33  ;;  %v1255_v54 = vsel %vm1253_vm8, %v1246_v35, %v3409_v11  ;;  %vm1497_vm9 = vcmask 900096  }
 0x11d   :  { %v742_v39 = vsel %vm3470_vm2, 0.0, %v733_v37  ;;  %3015 = vmatpush3.msk.msra.mxu0 %vm257_vm6, %v743_v38 }
 0x11e   :  { %2909 = vmatprep.subr.msk.mxu1 %vm257_vm6, %v742_v39  ;;  %3017 = vmatmul.mubr.msk.f32.vlgmr.msra.gmra.mrb[0].mxu0 %vm254_vm7, %v3364_v46 }
 0x11f   :  { %2914 = vmatprep.subr.msk.mxu0 %vm257_vm6, %v1001_v41  ;;  %v3499_v44 = vpop.permute.xlu0 %1752  ;;  %2910 = vmatpush1.msk.msra.mxu1 %vm257_vm6, %v741_v40  ;;  %v1244_v45 = vpop.permute.xlu1 %1243 }
 0x120   :  { %2915 = vmatpush1.msk.msra.mxu0 %vm257_vm6, %v1000_v43  ;;  %2911 = vmatmul.mubr.msk.f32.vlgmr.msra.gmra.mrb[2].mxu1 %vm254_vm7, %v3364_v46  ;;  %v1254_v55 = vsel %vm1253_vm8, %v1244_v45, %v1246_v35 }
 0x121   :  { %1088 = vmatprep.mubr.f32.mxu0 %v3190_v24  ;;  %3019 = vmatprep.subr.mxu0 %v3190_v24 }
 0x122   :  { %2916 = vmatmul.mubr.msk.f32.vlgmr.msra.gmra.mrb[2].mxu0 %vm254_vm7, %v3366_v47  ;;  %1159 = vmatprep.mubr.f32.mxu1 %v3190_v24 }
 0x123   :  { %v989_v49 = vpop.permute.xlu0 %988  ;;  %v1250_v50 = vpop.permute.xlu1 %1249  ;;  %3021 = vmatprep.mubr.msk.f32.mxu0 %vm3193_vm4, %v3190_v24 }
 0x124   :  { %v994_v46 = vsel %vm990_vm0, %v987_v28, %v989_v49  ;;  %v1004_v51 = vsel %vm3320_vm5, 0.0, %v989_v49  ;;  %v1256_v1 = vsel %vm1253_vm8, %v3409_v11, %v1250_v50  ;;  %vm1758_vm0 = vcmask 785408  }
 0x125   :  { %v1003_v52 = vsel %vm3427_vm14, 0.0, %v994_v46  ;;  %3020 = vmatpush3.msk.msra.mxu0 %vm257_vm6, %v1004_v51 }
 0x126   :  { %2917 = vmatprep.subr.msk.mxu1 %vm257_vm6, %v1003_v52  ;;  %3022 = vmatmul.mubr.msk.f32.vlgmr.msra.gmra.mrb[0].mxu0 %vm254_vm7, %v3366_v47 }
 0x127   :  { %2922 = vmatprep.subr.msk.mxu0 %vm257_vm6, %v1255_v54  ;;  %v3529_v56 = vpop.permute.xlu0 %1773  ;;  %2918 = vmatpush1.msk.msra.mxu1 %vm257_vm6, %v1002_v53  ;;  %v1490_v58 = vpop.permute.xlu1 %1489 }
 0x128   :  { %2923 = vmatpush1.msk.msra.mxu0 %vm257_vm6, %v1254_v55  ;;  %2919 = vmatmul.mubr.msk.f32.vlgmr.msra.gmra.mrb[2].mxu1 %vm254_vm7, %v3366_v47  ;;  %v1499_v59 = vsel %vm1497_vm9, %v1490_v58, %v3450_v22 }
 0x129   :  { %1334 = vmatprep.mubr.f32.mxu0 %v3190_v24  ;;  %3024 = vmatprep.subr.mxu0 %v3190_v24  ;;  %v1508_v47 = vsel %vm3377_vm10, 0.0, %v1499_v59 }
 0x12a   :  { %2924 = vmatmul.mubr.msk.f32.vlgmr.msra.gmra.mrb[2].mxu0 %vm254_vm7, %v3434_v17  ;;  %1405 = vmatprep.mubr.f32.mxu1 %v3190_v24 }
 0x12b   :  { %v1252_v60 = vpop.permute.xlu0 %1251  ;;  %v1488_v61 = vpop.permute.xlu1 %1487  ;;  %3026 = vmatprep.mubr.msk.f32.mxu0 %vm3193_vm4, %v3190_v24 }
 0x12c   :  { %v1257_v62 = vsel %vm1253_vm8, %v1250_v50, %v1252_v60  ;;  %v1498_v63 = vsel %vm1497_vm9, %v1488_v61, %v1490_v58  ;;  %3025 = vmatpush3.msk.msra.mxu0 %vm257_vm6, %v1252_v60 }
 0x12d   :  { %v1507_v2 = vsel %vm3390_vm11, 0.0, %v1498_v63  ;;  %2925 = vmatprep.subr.msk.mxu1 %vm257_vm6, %v1257_v62  ;;  %2930 = vmatprep.subr.msk.mxu0 %vm257_vm6, %v1508_v47 }
 0x12e   :  { %2926 = vmatpush1.msk.msra.mxu1 %vm257_vm6, %v1256_v1  ;;  %3027 = vmatmul.mubr.msk.f32.vlgmr.msra.gmra.mrb[0].mxu0 %vm254_vm7, %v3434_v17 }
 0x12f   :  { %2931 = vmatpush1.msk.msra.mxu0 %vm257_vm6, %v1507_v2  ;;  %v3559_v3 = vpop.permute.xlu0 %2015  ;;  %v1494_v4 = vpop.permute.xlu1 %1493  ;;  %1595 = vmatprep.mubr.f32.mxu0 %v3190_v24 }
 0x130   :  { %2927 = vmatmul.mubr.msk.f32.vlgmr.msra.gmra.mrb[2].mxu1 %vm254_vm7, %v3434_v17  ;;  %3029 = vmatprep.subr.mxu0 %v3190_v24  ;;  %v1500_v6 = vsel %vm1497_vm9, %v3450_v22, %v1494_v4 }
 0x131   :  { %1666 = vmatprep.mubr.f32.mxu1 %v3190_v24  ;;  %v1509_v18 = vsel %vm3474_vm3, 0.0, %v1500_v6 }
 0x132   :  { %2932 = vmatmul.mubr.msk.f32.vlgmr.msra.gmra.mrb[2].mxu0 %vm254_vm7, %v3459_v27 }
 0x133   :  { %v1496_v8 = vpop.permute.xlu0 %1495  ;;  %v1751_v10 = vpop.permute.xlu1 %1750  ;;  %3031 = vmatprep.mubr.msk.f32.mxu0 %vm3193_vm4, %v3190_v24 }
 0x134   :  { %v1501_v11 = vsel %vm1497_vm9, %v1494_v4, %v1496_v8  ;;  %v1511_v12 = vsel %vm3466_vm1, 0.0, %v1496_v8  ;;  %v1760_v13 = vsel %vm1758_vm0, %v1751_v10, %v3499_v44 }
 0x135   :  { %v1510_v14 = vsel %vm3470_vm2, 0.0, %v1501_v11  ;;  %v1769_v17 = vsel %vm3403_vm12, 0.0, %v1760_v13  ;;  %3030 = vmatpush3.msk.msra.mxu0 %vm257_vm6, %v1511_v12  ;;  %vm2021_vm12 = vcmask 777216  }
 0x136   :  { %2933 = vmatprep.subr.msk.mxu1 %vm257_vm6, %v1510_v14  ;;  %3032 = vmatmul.mubr.msk.f32.vlgmr.msra.gmra.mrb[0].mxu0 %vm254_vm7, %v3459_v27 }
 0x137   :  { %2938 = vmatprep.subr.msk.mxu0 %vm257_vm6, %v1769_v17  ;;  %v2010_v19 = vpop.permute.xlu0 %2009  ;;  %2934 = vmatpush1.msk.msra.mxu1 %vm257_vm6, %v1509_v18  ;;  %v1749_v20 = vpop.permute.xlu1 %1748 }
 0x138   :  { %v1759_v22 = vsel %vm1758_vm0, %v1749_v20, %v1751_v10  ;;  %2935 = vmatmul.mubr.msk.f32.vlgmr.msra.gmra.mrb[2].mxu1 %vm254_vm7, %v3459_v27  ;;  %1856 = vmatprep.mubr.f32.mxu0 %v3190_v24 }
 0x139   :  { %v1768_v9 = vsel %vm3420_vm13, 0.0, %v1759_v22  ;;  %1927 = vmatprep.mubr.f32.mxu1 %v3190_v24  ;;  %vm2584_vm13 = vcmask 523264  }
 0x13a   :  { %2939 = vmatpush1.msk.msra.mxu0 %vm257_vm6, %v1768_v9 }
 0x13b   :  { %v1757_v25 = vpop.permute.xlu0 %1756  ;;  %2940 = vmatmul.mubr.msk.f32.vlgmr.msra.gmra.mrb[2].mxu0 %vm254_vm7, %v3529_v56  ;;  %v1755_v26 = vpop.permute.xlu1 %1754  ;;  %3034 = vmatprep.subr.mxu0 %v3190_v24 }
 0x13c   :  { %v1772_v28 = vsel %vm3320_vm5, 0.0, %v1757_v25  ;;  %v1761_v27 = vsel %vm1758_vm0, %v3499_v44, %v1755_v26  ;;  %v1762_v15 = vsel %vm1758_vm0, %v1755_v26, %v1757_v25  ;;  %3036 = vmatprep.mubr.msk.f32.mxu0 %vm3193_vm4, %v3190_v24  ;;  %vm2265_vm5 = vcmask 769024  }
 0x13d   :  { %v1770_v23 = vsel %vm3445_vm15, 0.0, %v1761_v27  ;;  %v1771_v32 = vsel %vm3427_vm14, 0.0, %v1762_v15  ;;  %3035 = vmatpush3.msk.msra.mxu0 %vm257_vm6, %v1772_v28  ;;  %vm2653_vm14 = vcmask 64512   ;;  %vm2626_vm15 = vcmask 7168  }
 0x13e   :  { %2941 = vmatprep.subr.msk.mxu1 %vm257_vm6, %v1771_v32 }
 0x13f   :  { %v2260_v42 = vpop.permute.xlu0 %2259  ;;  %2942 = vmatpush1.msk.msra.mxu1 %vm257_vm6, %v1770_v23  ;;  %3037 = vmatmul.mubr.msk.f32.vlgmr.msra.gmra.mrb[0].mxu0 %vm254_vm7, %v3529_v56  ;;  %v2014_v33 = vpop.permute.xlu1 %2013 }
 0x140   :  { %v2023_v35 = vsel %vm2021_vm12, %v2014_v33, %v3559_v3  ;;  %2943 = vmatmul.mubr.msk.f32.vlgmr.msra.gmra.mrb[2].mxu1 %vm254_vm7, %v3529_v56  ;;  %2102 = vmatprep.mubr.f32.mxu0 %v3190_v24 }
 0x141   :  { %2946 = vmatprep.subr.msk.mxu0 %vm257_vm6, %v2023_v35  ;;  %2173 = vmatprep.mubr.f32.mxu1 %v3190_v24 }
 0x143   :  { %v2012_v16 = vpop.permute.xlu1 %2011  ;;  %v2020_v21 = vpop.permute.xlu0 %2019 }
 0x144   :  { %v2022_v36 = vsel %vm2021_vm12, %v2012_v16, %v2014_v33 }
 0x145   :  { %2947 = vmatpush1.msk.msra.mxu0 %vm257_vm6, %v2022_v36 }
 0x146   :  { %2948 = vmatmul.mubr.msk.f32.vlgmr.msra.gmra.mrb[2].mxu0 %vm254_vm7, %v2010_v19  ;;  %3039 = vmatprep.subr.mxu0 %v3190_v24 }
 0x147   :  { %3040 = vmatpush3.msk.msra.mxu0 %vm257_vm6, %v2020_v21  ;;  %v2018_v37 = vpop.permute.xlu1 %2017  ;;  %3041 = vmatprep.mubr.msk.f32.mxu0 %vm3193_vm4, %v3190_v24  ;;  %v2281_v40 = vpop.permute.xlu0 %2280 }
 0x148   :  { %v2024_v38 = vsel %vm2021_vm12, %v3559_v3, %v2018_v37  ;;  %v2025_v39 = vsel %vm2021_vm12, %v2018_v37, %v2020_v21 }
 0x149   :  { %2949 = vmatprep.subr.msk.mxu1 %vm257_vm6, %v2025_v39 }
 0x14a   :  { %2950 = vmatpush1.msk.msra.mxu1 %vm257_vm6, %v2024_v38  ;;  %3042 = vmatmul.mubr.msk.f32.vlgmr.msra.gmra.mrb[0].mxu0 %vm254_vm7, %v2010_v19 }
 0x14b   :  { %2951 = vmatmul.mubr.msk.f32.vlgmr.msra.gmra.mrb[2].mxu1 %vm254_vm7, %v2010_v19  ;;  %v2258_v41 = vpop.permute.xlu1 %2257  ;;  %2363 = vmatprep.mubr.f32.mxu0 %v3190_v24  ;;  %v2264_v48 = vpop.permute.xlu0 %2263 }
 0x14c   :  { %v2267_v43 = vsel %vm2265_vm5, %v2258_v41, %v2260_v42  ;;  %2434 = vmatprep.mubr.f32.mxu1 %v3190_v24  ;;  %v2279_v46 = vsel %vm3466_vm1, 0.0, %v2264_v48  ;;  %vm2854_vm1 = vcmask 9216  }
 0x14d   :  { %v2276_v44 = vsel %vm3377_vm10, 0.0, %v2267_v43  ;;  %vm2558_vm10 = vcmp.lt.s32.totalorder %v3397_v5, 272  ;;  %v2632_v43 = vld [vmem:[%s3695_s0 + $0x20] sm:$0xff] }
 0x14e   :  { %2954 = vmatprep.subr.msk.mxu0 %vm257_vm6, %v2276_v44 }
 0x14f   :  { %v2256_v45 = vpop.permute.xlu1 %2255 }
 0x150   :  { %v2266_v49 = vsel %vm2265_vm5, %v2256_v45, %v2258_v41  ;;  %v2631_v41 = vld [vmem:[%s3695_s0 + $0x18] sm:$0xff] }
 0x151   :  { %v2275_v50 = vsel %vm3390_vm11, 0.0, %v2266_v49  ;;  %vm2598_vm11 = vcmp.lt.s32.totalorder %v3300_v34, 560  ;;  %v2630_v34 = vld [vmem:[%s3695_s0 + $0x10] sm:$0xff] }
 0x152   :  { %2955 = vmatpush1.msk.msra.mxu0 %vm257_vm6, %v2275_v50  ;;  %v3207_v50 = vmov 0.0|0.0  }
 0x153   :  { %2956 = vmatmul.mubr.msk.f32.vlgmr.msra.gmra.mrb[2].mxu0 %vm254_vm7, %v2281_v40  ;;  %3044 = vmatprep.subr.mxu0 %v3190_v24  ;;  %v2262_v57 = vpop.permute.xlu1 %2261 }
 0x154   :  { %v2268_v51 = vsel %vm2265_vm5, %v2260_v42, %v2262_v57  ;;  %v2269_v52 = vsel %vm2265_vm5, %v2262_v57, %v2264_v48  ;;  %3045 = vmatpush3.msk.msra.mxu0 %vm257_vm6, %v2279_v46  ;;  %3046 = vmatprep.mubr.msk.f32.mxu0 %vm3193_vm4, %v3190_v24  ;;  %v2775_v46 = vld [vmem:[%s3695_s0 + $0x28] sm:$0x3]  ;;  %v3208_v57 = vmov 32  }
 0x155   :  { %v2277_v0 = vsel %vm3474_vm3, 0.0, %v2268_v51  ;;  %v2278_v29 = vsel %vm3470_vm2, 0.0, %v2269_v52 }
 0x156   :  { %2957 = vmatprep.subr.msk.mxu1 %vm257_vm6, %v2278_v29 }
 0x157   :  { %2958 = vmatpush1.msk.msra.mxu1 %vm257_vm6, %v2277_v0  ;;  %3047 = vmatmul.mubr.msk.f32.vlgmr.msra.gmra.mrb[0].mxu0 %vm254_vm7, %v2281_v40  ;;  %vm2551_vm6 = vcmp.ge.s32.totalorder %v3254_v7, 16 }
 0x158   :  { %2959 = vmatmul.mubr.msk.f32.vlgmr.msra.gmra.mrb[2].mxu1 %vm254_vm7, %v2281_v40  ;;  %vm2591_vm7 = vcmp.ge.s32.totalorder %v3397_v5, 304  ;;  %v2629_v5 = vld [vmem:[%s3695_s0 + $0x8] sm:$0xff]  ;;  %v3206_v40 = vmov 8  }
 0x159   :  { %3051 = vmatprep.mubr.msk.f32.mxu1 %vm2653_vm14, %v2629_v5  ;;  %3144 = vset.pattern.permute.xlu1 %v3206_v40 }
 0x15a   :  { %3143 = vset.pattern.permute.xlu0 %v3206_v40 }
 0x1e2   :  { %v476_v53 = vpop.f32.mrb[4].mxu1 }
 0x1e3   :  { %v3008_v54 = vpop.f32.mrb[5].mxu1 }
 0x1e6   :  { %v563_v55 = vpop.f32.mrb[0].mxu1 }
 0x1e7   :  { %v565_v56 = vpop.f32.mrb[1].mxu1 }
 0x226   :  { %v2365_v58 = vpop.f32.mrb[2].mxu0 }
 0x227   :  { %v3074_v59 = vadd.f32 %v2365_v58, %v563_v55  ;;  %v2367_v60 = vpop.f32.mrb[3].mxu0 }
 0x228   :  { %v3075_v31 = vadd.f32 %v2367_v60, %v565_v56 }
 0x229   :  { %v2962_v61 = vmul.f32 -1.442695, %v3074_v59 }
 0x22a   :  { %v2963_v47 = vmul.f32 -1.442695, %v3075_v31  ;;  %v2507_v30 = vpop.f32.mrb[0].mxu0 }
 0x22b   :  { %3147 = vpow2.f32 %v2962_v61  ;;  %v3076_v62 = vadd.f32 %v2507_v30, %v476_v53  ;;  %v2436_v63 = vpop.f32.mrb[2].mxu1  ;;  %v3048_v1 = vpop.f32.mrb[1].mxu0 }
 0x22c   :  { %3149 = vpow2.f32 %v2963_v47  ;;  %v2964_v2 = vmul.f32 -1.442695, %v2436_v63  ;;  %v2438_v3 = vpop.f32.mrb[3].mxu1 }
 0x22d   :  { %v2966_v4 = vmul.f32 -1.442695, %v3076_v62  ;;  %v2965_v6 = vmul.f32 -1.442695, %v2438_v3 }
 0x22e   :  { %3151 = vpow2.f32 %v2964_v2 }
 0x22f   :  { %3153 = vpow2.f32 %v2966_v4 }
 0x230   :  { %3155 = vpow2.f32 %v2965_v6 }
 0x235   :  { %v3148_v8 = vpop.eup %3147 }
 0x236   :  { %v3150_v10 = vpop.eup %3149  ;;  %v2531_v11 = vadd.f32 1.0, %v3148_v8 }
 0x237   :  { %v2532_v12 = vadd.f32 1.0, %v3150_v10 }
 0x238   :  { %v3152_v13 = vpop.eup %3151  ;;  %3157 = vrcp.f32 %v2531_v11 }
 0x239   :  { %v3154_v14 = vpop.eup %3153  ;;  %3159 = vrcp.f32 %v2532_v12  ;;  %v2533_v17 = vadd.f32 1.0, %v3152_v13 }
 0x23a   :  { %v3156_v18 = vpop.eup %3155  ;;  %v2535_v19 = vadd.f32 1.0, %v3154_v14 }
 0x23b   :  { %3161 = vrcp.f32 %v2533_v17  ;;  %v2534_v20 = vadd.f32 1.0, %v3156_v18 }
 0x23c   :  { %3163 = vrcp.f32 %v2535_v19 }
 0x23d   :  { %3165 = vrcp.f32 %v2534_v20 }
 0x242   :  { %v3158_v22 = vpop.eup %3157 }
 0x243   :  { %v3160_v9 = vpop.eup %3159  ;;  %v2546_v25 = vmul.f32 %v3158_v22, %v3074_v59 }
 0x244   :  { %v2547_v26 = vmul.f32 %v3160_v9, %v3075_v31 }
 0x245   :  { %v3162_v28 = vpop.eup %3161  ;;  %v2576_v27 = vsel %vm2551_vm6, %v2546_v25, 0.0 }
 0x246   :  { %v3164_v15 = vpop.eup %3163  ;;  %v2548_v23 = vmul.f32 %v3162_v28, %v2436_v63  ;;  %v2581_v32 = vadd.f32 %v2576_v27, %v2547_v26 }
 0x247   :  { %v3166_v42 = vpop.eup %3165  ;;  %v2550_v33 = vmul.f32 %v3164_v15, %v3076_v62 }
 0x248   :  { %v2616_v35 = vsel %vm2591_vm7, %v2548_v23, 0.0  ;;  %v2549_v16 = vmul.f32 %v3166_v42, %v2438_v3  ;;  %v2578_v7 = vsel %vm2558_vm10, %v2548_v23, 0.0 }
 0x249   :  { %v2582_v21 = vadd.f32 %v2581_v32, %v2578_v7  ;;  %v2618_v36 = vsel %vm2598_vm11, %v2550_v33, 0.0 }
 0x24a   :  { %v2621_v37 = vadd.f32 %v2616_v35, %v2549_v16  ;;  %v2622_v38 = vsel %vm2584_vm13, %v2618_v36, 0.0 }
 0x24b   :  { %2587 = vadd.xlane.f32.xlu1 %v2582_v21 }
 0x24c   :  { %v2623_v39 = vadd.f32 %v2622_v38, %v2621_v37 }
 0x24e   :  { %2624 = vadd.xlane.f32.xlu0 %v2623_v39 }
 0x25c   :  { %2640 = vperm.xlu1 %3144, %v2630_v34  }
 0x260   :  { %2645 = vperm.xlu1 %3144, %v2631_v41  }
 0x264   :  { %2635 = vperm.xlu0 %3143, %v2629_v5   ;;  %2650 = vperm.xlu1 %3144, %v2632_v43  }
 0x268   :  { %3145 = vset.pattern.permute.xlu1 %v3208_v57  ;;  %3146 = vset.pattern.permute.xlu0 %v3208_v57 }
 0x269   :  { %2778 = vperm.xlu1 %3145, %v2775_v46  }
 0x2d8   :  { %v2588_v44 = vpop.xlane.xlu1 %2587 }
 0x2db   :  { %v2625_v45 = vpop.xlane.xlu0 %2624 }
 0x2dc   :  { %v2627_v48 = vsel %vm2626_vm15, %v2588_v44, %v2625_v45  ;;  %v2641_v51 = vpop.permute.xlu1 %2640 }
 0x2dd   :  { %v2628_v49 = vmul.f32 0.00390625, %v2627_v48 }
 0x2df   :  { %3049 = vmatprep.subr.mxu1 %v2628_v49 }
 0x2e0   :  { %3050 = vmatpush3.msra.mxu1 %v2628_v49  ;;  %v2646_v52 = vpop.permute.xlu1 %2645 }
 0x2e1   :  { %3052 = vmatmul.mubr.msk.f32.vlgmr.msra.gmra.mrb[6].mxu1 %vm2653_vm14, %v2630_v34  ;;  %3068 = vmatprep.subr.bf16.mxu1 %v3207_v50 }
 0x2e2   :  { %3054 = vmatprep.mubr.msk.f32.mxu1 %vm2653_vm14, %v2631_v41 }
 0x2e3   :  { %v2636_v0 = vpop.permute.xlu0 %2635 }
 0x2e5   :  { %3055 = vmatmul.mubr.msk.f32.gmra.mrb[8].mxu1 %vm2653_vm14, %v2632_v43 }
 0x2e6   :  { %3065 = vmatprep.mubr.msk.f32.mxu1 %vm3193_vm4, %v3190_v24  ;;  %v2651_v24 = vpop.permute.xlu1 %2650  ;;  %vm2781_vm4 = vcmask 261120  }
 0x2ea   :  { %v2779_v9 = vpop.permute.xlu1 %2778 }
 0x3b4   :  { %v3053_v29 = vpop.f32.mrb[6].mxu1 }
 0x3b5   :  { %v2734_v53 = vadd.f32 %v3053_v29, %v2641_v51  ;;  %v2728_v54 = vpop.f32.mrb[7].mxu1 }
 0x3b6   :  { %v2729_v55 = vadd.f32 %v2728_v54, %v2636_v0 }
 0x3b7   :  { %v2972_v56 = vmul.f32 -1.442695, %v2734_v53 }
 0x3b8   :  { %v2971_v58 = vmul.f32 -1.442695, %v2729_v55  ;;  %v3056_v59 = vpop.f32.mrb[8].mxu1 }
 0x3b9   :  { %3167 = vpow2.f32 %v2972_v56  ;;  %v2744_v60 = vadd.f32 %v3056_v59, %v2651_v24  ;;  %v2738_v31 = vpop.f32.mrb[9].mxu1 }
 0x3ba   :  { %3169 = vpow2.f32 %v2971_v58  ;;  %v2739_v61 = vadd.f32 %v2738_v31, %v2646_v52 }
 0x3bb   :  { %v2974_v47 = vmul.f32 -1.442695, %v2744_v60 }
 0x3bc   :  { %v2973_v30 = vmul.f32 -1.442695, %v2739_v61 }
 0x3bd   :  { %3171 = vpow2.f32 %v2974_v47 }
 0x3be   :  { %3173 = vpow2.f32 %v2973_v30 }
 0x3c3   :  { %v3168_v62 = vpop.eup %3167 }
 0x3c4   :  { %v3170_v63 = vpop.eup %3169  ;;  %v2760_v1 = vadd.f32 1.0, %v3168_v62 }
 0x3c5   :  { %v2759_v2 = vadd.f32 1.0, %v3170_v63 }
 0x3c6   :  { %3175 = vrcp.f32 %v2760_v1 }
 0x3c7   :  { %v3172_v3 = vpop.eup %3171  ;;  %3177 = vrcp.f32 %v2759_v2 }
 0x3c8   :  { %v3174_v4 = vpop.eup %3173  ;;  %v2762_v6 = vadd.f32 1.0, %v3172_v3 }
 0x3c9   :  { %v2761_v8 = vadd.f32 1.0, %v3174_v4 }
 0x3ca   :  { %3179 = vrcp.f32 %v2762_v6 }
 0x3cb   :  { %3181 = vrcp.f32 %v2761_v8 }
 0x3d0   :  { %v3176_v10 = vpop.eup %3175 }
 0x3d1   :  { %v3178_v11 = vpop.eup %3177  ;;  %v2772_v12 = vmul.f32 %v3176_v10, %v2734_v53 }
 0x3d2   :  { %v2771_v13 = vmul.f32 %v3178_v11, %v2729_v55 }
 0x3d4   :  { %v3180_v14 = vpop.eup %3179  ;;  %v3069_v17 = vpack.c.bf16 %v2772_v12, %v2771_v13 }
 0x3d5   :  { %v3182_v18 = vpop.eup %3181  ;;  %v2774_v19 = vmul.f32 %v3180_v14, %v2744_v60 }
 0x3d6   :  { %v2773_v20 = vmul.f32 %v3182_v18, %v2739_v61  ;;  %3070 = vmatpush3.bf16.msra.mxu1 %v3069_v17 }
 0x3d7   :  { %3071 = vmatprep.subr.bf16.mxu1 %v3207_v50 }
 0x3d8   :  { %v3072_v22 = vpack.c.bf16 %v2774_v19, %v2773_v20 }
 0x3da   :  { %3073 = vmatpush3.bf16.msra.mxu1 %v3072_v22 }
 0x3dd   :  { %3066 = vmatmul.mubr.msk.f32.vlgmr.msra.gmra.mrb[10].mxu1 %vm2781_vm4, %v2775_v46 }
 0x4b0   :  { %v2850_v25 = vpop.f32.mrb[10].mxu1 }
 0x4b1   :  { %v2851_v26 = vadd.f32 %v2850_v25, %v2779_v9  ;;  %v3067_v28 = vpop.f32.mrb[11].mxu1 }
 0x4b3   :  { %v2855_v27 = vsel %vm2854_vm1, %v2851_v26, -inf }
 0x4b4   :  { %v2856_v15 = vrot.slane %v2855_v27, 4 }
 0x4b6   :  { %v2857_v23 = vmax.f32 %v2855_v27, %v2856_v15 }
 0x4b8   :  { %v2858_v32 = vrot.slane %v2857_v23, 2 }
 0x4ba   :  { %v2859_v42 = vmax.f32 %v2857_v23, %v2858_v32 }
 0x4bc   :  { %v2860_v33 = vrot.slane %v2859_v42, 1 }
 0x4be   :  { %v2861_v35 = vmax.f32 %v2859_v42, %v2860_v33 }
 0x4c0   :  { %v2862_v16 = vsub.f32 %v2851_v26, %v2861_v35 }
 0x4c2   :  { %v2863_v7 = vmul.f32 1.442695, %v2862_v16 }
 0x4c4   :  { %3183 = vpow2.f32 %v2863_v7 }
 0x4ce   :  { %v3184_v21 = vpop.eup %3183 }
 0x4cf   :  { %v2865_v36 = vsel %vm2854_vm1, %v3184_v21, 0.0 }
 0x4d0   :  { %v2866_v37 = vrot.slane %v2865_v36, 4 }
 0x4d2   :  { %v2867_v38 = vadd.f32 %v2866_v37, %v2865_v36 }
 0x4d4   :  { %v2868_v39 = vrot.slane %v2867_v38, 2 }
 0x4d6   :  { %v2869_v5 = vadd.f32 %v2868_v39, %v2867_v38 }
 0x4d8   :  { %v2870_v34 = vrot.slane %v2869_v5, 1 }
 0x4da   :  { %v2871_v40 = vadd.f32 %v2870_v34, %v2869_v5 }
 0x4dc   :  { %3185 = vlog2.f32 %v2871_v40 }
 0x4e6   :  { %v3186_v41 = vpop.eup %3185 }
 0x4e7   :  { %v2873_v43 = vmul.f32 0.6931472, %v3186_v41 }
 0x4e9   :  { %v2874_v44 = vsub.f32 %v2862_v16, %v2873_v43 }
 0x4eb   :  { %2875 = vst.msk [vmem:[%s3700_s5] sm:$0x3] %vm2854_vm1, %v2874_v44 }

</bundles_post_ra>
